<compile_context>
chip_gen: v6e
topology: v6e:2x2x1
jax: 0.10.0
libtpu: 0.0.40
codegen_flags: <defaults>
</compile_context>

<pallas_src>
import jax
import jax.numpy as jnp
from jax.experimental import pallas as pl
from jax.experimental.pallas import tpu as pltpu


def _outconv_kernel(x_ref, w_ref, b_ref, o_ref):
    # x_ref: (Cin, THW), w_ref: (Cout, Cin), b_ref: (Cout, 1), o_ref: (Cout, THW)
    acc = jnp.dot(w_ref[...], x_ref[...], preferred_element_type=jnp.float32)
    o_ref[...] = (acc + b_ref[...]).astype(o_ref.dtype)


def _choose_spatial_tile(hw: int, target: int = 2048) -> int:
    """Pick a lane-dense spatial tile that divides H*W exactly (no pad copies)."""
    if hw <= target:
        return hw                       # full spatial extent -> always legal
    if hw % 128 == 0:
        for t in range(target - (target % 128), 127, -128):
            if hw % t == 0:
                return t
    return hw                           # fallback: one full-HW block per image


@jax.jit
def outconv_pallas(x_nchw, weight, bias):
    """1x1 Conv2d forward (PyTorch OutConv).

    Args:
      x_nchw: (N, Cin, H, W)
      weight: (Cout, Cin, 1, 1)   (PyTorch Conv2d weight layout)
      bias:   (Cout,)
    Returns:
      (N, Cout, H, W)
    """
    N, Cin, H, W = x_nchw.shape
    Cout = weight.shape[0]
    HW = H * W

    # Pure reshapes on the NCHW layout -- no transposes, no padding copies.
    x = x_nchw.reshape(N, Cin, HW)            # (N, Cin, HW)
    w_mat = weight.reshape(Cout, Cin)         # (Cout, Cin)
    b_col = bias.reshape(Cout, 1)             # (Cout, 1)

    t_hw = _choose_spatial_tile(HW)
    grid = (N, HW // t_hw)

    itemsize = jnp.dtype(x_nchw.dtype).itemsize
    cost = pl.CostEstimate(
        flops=2 * N * HW * Cin * Cout,
        transcendentals=0,
        bytes_accessed=(N * Cin * HW + N * Cout * HW) * itemsize
        + (Cout * Cin + Cout) * itemsize,
    )

    out = pl.pallas_call(
        _outconv_kernel,
        out_shape=jax.ShapeDtypeStruct((N, Cout, HW), x_nchw.dtype),
        grid=grid,
        in_specs=[
            # Leading `None` squeezes the per-image dim inside the kernel.
            pl.BlockSpec((None, Cin, t_hw), lambda n, h: (n, 0, h)),
            pl.BlockSpec((Cout, Cin), lambda n, h: (0, 0)),   # VMEM-resident weight
            pl.BlockSpec((Cout, 1), lambda n, h: (0, 0)),     # VMEM-resident bias
        ],
        out_specs=pl.BlockSpec((None, Cout, t_hw), lambda n, h: (n, 0, h)),
        compiler_params=pltpu.CompilerParams(
            # Both axes are independent (no reduction) -> shard across the two
            # TensorCores on v7x; harmless on v5e/v6e.
            dimension_semantics=("parallel", "parallel"),
        ),
        cost_estimate=cost,
    )(x, w_mat, b_col)

    # (N, Cout, HW) -> (N, Cout, H, W): pure reshape, already NCHW ordered.
    return out.reshape(N, Cout, H, W)


if __name__ == "__main__":
    key = jax.random.PRNGKey(0)
    k_x, k_w, k_b = jax.random.split(key, 3)

    # Module config: in_channels=4, out_channels=3; input (N=2, C=4, H=16, W=16)
    N, Cin, Cout, H, W = 2, 4, 3, 16, 16

    x = jax.random.normal(k_x, (N, Cin, H, W), dtype=jnp.float32)

    # Deterministic parameter init mimicking nn.Conv2d defaults
    # (uniform in [-1/sqrt(fan_in), 1/sqrt(fan_in)], fan_in = Cin*1*1).
    bound = 1.0 / jnp.sqrt(jnp.float32(Cin))
    weight = jax.random.uniform(k_w, (Cout, Cin, 1, 1), dtype=jnp.float32,
                                minval=-bound, maxval=bound)
    bias = jax.random.uniform(k_b, (Cout,), dtype=jnp.float32,
                              minval=-bound, maxval=bound)

    out = outconv_pallas(x, weight, bias)
    out = jax.block_until_ready(out)

    # Pure-JAX reference for the 1x1 conv.
    ref = jnp.einsum("nchw,oc->nohw", x, weight.reshape(Cout, Cin)) \
          + bias.reshape(1, Cout, 1, 1)

    assert out.shape == (N, Cout, H, W), out.shape
    assert jnp.allclose(out, ref, atol=1e-5, rtol=1e-5), \
        float(jnp.max(jnp.abs(out - ref)))

    print("KERNEL_OK")
</pallas_src>

<mosaic_0001>
module attributes {stable_mosaic.version = 11 : i64} {
  func.func @_outconv_kernel(%arg0: i32, %arg1: i32, %arg2: memref<1x4x256xf32, #tpu.memory_space<vmem>>, %arg3: memref<3x4xf32, #tpu.memory_space<vmem>>, %arg4: memref<3x1xf32, #tpu.memory_space<vmem>>, %arg5: memref<1x3x256xf32, #tpu.memory_space<vmem>>) attributes {dimension_semantics = [#tpu.dimension_semantics<parallel>, #tpu.dimension_semantics<parallel>], iteration_bounds = array<i64: 2, 1>, scalar_prefetch = 0 : i64, scratch_operands = 0 : i64, tpu.core_type = #tpu.core_type<tc>, window_params = [{transform_indices = @transform_0, window_bounds = array<i64: 1, 4, 256>}, {pipeline_mode = #tpu.pipeline_mode<synchronous>, transform_indices = @transform_1, window_bounds = array<i64: 3, 4>}, {pipeline_mode = #tpu.pipeline_mode<synchronous>, transform_indices = @transform_2, window_bounds = array<i64: 3, 1>}, {transform_indices = @transform_3, window_bounds = array<i64: 1, 3, 256>}]} {
    %c0 = arith.constant 0 : index
    %c0_0 = arith.constant 0 : index
    %0 = vector.load %arg3[%c0, %c0_0] : memref<3x4xf32, #tpu.memory_space<vmem>>, vector<3x4xf32>
    %c0_1 = arith.constant 0 : index
    %c0_2 = arith.constant 0 : index
    %c0_3 = arith.constant 0 : index
    %1 = vector.load %arg2[%c0_1, %c0_2, %c0_3] : memref<1x4x256xf32, #tpu.memory_space<vmem>>, vector<1x4x256xf32>
    %2 = vector.shape_cast %1 : vector<1x4x256xf32> to vector<4x256xf32>
    %cst = arith.constant dense<0.000000e+00> : vector<3x256xf32>
    %3 = tpu.matmul %0, %2, %cst {dimension_numbers = #tpu.dot_dimension_numbers<[1], [0], [0], [1], [0, 0, 1, 1], [], []>} : vector<3x4xf32>, vector<4x256xf32>, vector<3x256xf32> -> vector<3x256xf32>
    %c0_4 = arith.constant 0 : index
    %c0_5 = arith.constant 0 : index
    %4 = vector.load %arg4[%c0_4, %c0_5] : memref<3x1xf32, #tpu.memory_space<vmem>>, vector<3x1xf32>
    %5 = vector.broadcast %4 : vector<3x1xf32> to vector<3x256xf32>
    %6 = arith.addf %3, %5 : vector<3x256xf32>
    %c0_6 = arith.constant 0 : index
    %c0_7 = arith.constant 0 : index
    %c0_8 = arith.constant 0 : index
    %7 = vector.load %arg5[%c0_6, %c0_7, %c0_8] : memref<1x3x256xf32, #tpu.memory_space<vmem>>, vector<1x3x256xf32>
    %8 = vector.shape_cast %7 : vector<1x3x256xf32> to vector<3x256xf32>
    %9 = vector.shape_cast %6 : vector<3x256xf32> to vector<1x3x256xf32>
    tpu.vector_store %arg5[%c0_6, %c0_7, %c0_8], %9 {strides = array<i32>} : memref<1x3x256xf32, #tpu.memory_space<vmem>>, vector<1x3x256xf32>,
    return
  }
  func.func @transform_0(%arg0: i32, %arg1: i32) -> (i32, i32, i32) {
    %c0_i32 = arith.constant 0 : i32
    %c0_i32_0 = arith.constant 0 : i32
    return %arg0, %c0_i32, %arg1 : i32, i32, i32
  }
  func.func @transform_1(%arg0: i32, %arg1: i32) -> (i32, i32) {
    %c0_i32 = arith.constant 0 : i32
    %c0_i32_0 = arith.constant 0 : i32
    %c0_i32_1 = arith.constant 0 : i32
    return %c0_i32, %c0_i32_0 : i32, i32
  }
  func.func @transform_2(%arg0: i32, %arg1: i32) -> (i32, i32) {
    %c0_i32 = arith.constant 0 : i32
    %c0_i32_0 = arith.constant 0 : i32
    %c0_i32_1 = arith.constant 0 : i32
    return %c0_i32, %c0_i32_0 : i32, i32
  }
  func.func @transform_3(%arg0: i32, %arg1: i32) -> (i32, i32, i32) {
    %c0_i32 = arith.constant 0 : i32
    %c0_i32_0 = arith.constant 0 : i32
    return %arg0, %c0_i32, %arg1 : i32, i32, i32
  }
}

</mosaic_0001>

<bundles_post_ra>
// kernel: outconv_pallas.1
= control target key start
LH: loop header
LB: loop body
LE: loop exit
PB: predicated region body
PF: predicated region fallthrough
CT: control target
= control target key end

     0   :  { %s482_s12 = smov 0   ;;  %s484_s13 = smov 0   ;;  %s521_s0 = inlined_call_operand.vmem [shape: f32[2,4,256], index: 0, kind: input, shape index: {}]   ;;  %s522_s1 = inlined_call_operand.vmem [shape: f32[3,4], index: 1, kind: input, shape index: {}]   ;;  %s523_s2 = inlined_call_operand.vmem [shape: f32[3,1], index: 2, kind: input, shape index: {}]   ;;  %s524_s3 = inlined_call_operand.vmem [shape: f32[2,3,256], index: 3, kind: output, shape index: {}]  }
   0x1   :  { %s486_s14 = smov 0  }
   0x2 LB: > { %s25_s15 = sadd.s32 1, %s454_s13  ;;  %p396_p0 = scmp.ge.s32.totalorder %s458_s14, 1  ;;  %s458_s14 = sphi %s486_s14, %s13_s14   ;;  %s454_s13 = sphi %s484_s13, %s526_s13   ;;  %s450_s12 = sphi %s482_s12, %s525_s12  }
   0x3   : > { %p27_p1 = scmp.ge.s32.totalorder %s25_s15, 2  ;;  %p158_p2 = scmp.lt.s32.totalorder %s458_s14, 3 }
   0x5   : > { %s528_s15 = smov (%p27_p1, %s25_s15), 0  ;;  %p159_p3 = pnand %p396_p0, %p158_p2 }
   0x6   : > { %p191_p4 = scmp.lt.s32.totalorder (!%p159_p3), %s450_s12, 1 }
   0x7   : > { %162 = sbr.rel (%p159_p3) target bundleno = 220 (0xdc), region = 32 }
   0xc   : > { %v460_v0 = vmov 0.0   ;;  %v212_v1 = vld [vmem:[%s523_s2] sm:$0x7]  ;;  %s530_s12 = smov (!%p191_p4, %s450_s12), 1  ;;  %v461_v2 = vmov 0   ;;  %vm224_vm0 = vcmask 1043456  }
   0xd   : > { %293 = vmatprep.mubr.f32.mxu0 %v460_v0  ;;  %434 = vset.pattern.permute.xlu0 %v461_v2  ;;  %s406_s18 = sshll.u32 %s530_s12, 3  ;;  %v210_v5 = vld [vmem:[%s522_s1] sm:$0x7]  ;;  %vm220_vm1 = vcmask 31744  }
   0xe   : > { %215 = vperm.xlu0 %434, %v212_v1   ;;  %s198_s21 = scalar_lea.vmem %s521_s0, %s406_s18  ;;  %s208_s26 = scalar_lea.vmem %s524_s3, %s406_s18 }
   0xf   : > { %v211_v3 = vld [vmem:[%s198_s21] sm:$0xff] }
  0x10   : > { %v219_v4 = vcombine.high %v211_v3, %v211_v3 }
  0x12   : > { %401 = vmatprep.subr.msk.mxu0 %vm224_vm0, %v219_v4 }
  0x13   : > { %402 = vmatpush1.msk.msra.mxu0 %vm224_vm0, %v211_v3 }
  0x14   : > { %403 = vmatmul.mubr.msk.f32.vlgmr.msra.gmra.mxu0 %vm220_vm1, %v210_v5 }
  0x89   : > { %v216_v6 = vpop.permute.xlu0 %215 }
  0xd4   : > { %v295_v7 = vpop.f32.mrf.mxu0 }
  0xd5   : > { %v296_v9 = vadd.f32 %v295_v7, %v216_v6 }
  0xd6   : > { %v297_v8 = vpop.f32.mrf.mxu0 }
  0xd7   : > { %v298_v10 = vadd.f32 %v297_v8, %v216_v6 }
  0xd9   : > { %v302_v11 = vcombine.low %v296_v9, %v298_v10 }
  0xdb   : > { %304 = vst [vmem:[%s208_s26] sm:$0x77] %v302_v11 }
  0xdc PF: > { %s13_s14 = sadd.s32 1, %s458_s14   ;;  %s525_s12 = smov %s454_s13 }
  0xdd   : > { %p10_p5 = scmp.ge.s32.totalorder %s13_s14, 4   ;;  %s526_s13 = smov %s528_s15 }
  0xdf   :  { %12 = sbr.rel (!%p10_p5) target bundleno = 2 (0x2), region = 62 }

</bundles_post_ra>
